<compile_context>
chip_gen: v6e
topology: v6e:2x2x1
jax: 0.10.0
libtpu: 0.0.40
codegen_flags: <defaults>
</compile_context>

<pallas_src>
import functools

import jax
import jax.numpy as jnp
from jax.experimental import pallas as pl
from jax.experimental.pallas import tpu as pltpu

_VMEM_LIMIT_BYTES = 56 * 1024 * 1024      # > 16/32 MiB scoped defaults, < v7x 64 MiB
_H_RESIDENT_BUDGET = 24 * 1024 * 1024     # allow <=24 MiB (incl. 2x buffering) for h


# ----------------------------- Pallas kernels --------------------------------
def _h_tile(h_ref, k, tk, resident):
    """Current reduction tile of h: sliced from the resident buffer or the full block."""
    if resident:
        off = pl.multiple_of(k * tk, tk)
        return h_ref[pl.ds(off, tk), :]
    return h_ref[...]


def gcn2_layer_kernel(a_ref, h_ref, x0_ref, w_ref, out_ref, acc_ref, *,
                      alpha, tk, resident):
    """One GCN2Conv layer (beta == 1.0):  out = relu((A' @ h + alpha*x0) @ W).

    A' = (1 - alpha) * A_hat is pre-folded in the wrapper (bf16).
    """
    k = pl.program_id(1)

    @pl.when(k == 0)
    def _():
        acc_ref[...] = jnp.zeros_like(acc_ref)

    acc_ref[...] += jnp.dot(a_ref[...], _h_tile(h_ref, k, tk, resident),
                            preferred_element_type=jnp.float32)

    @pl.when(k == pl.num_programs(1) - 1)
    def _():
        mixed = acc_ref[...] + alpha * x0_ref[...].astype(jnp.float32)  # f32 VPU math
        h_out = jnp.dot(mixed.astype(jnp.bfloat16), w_ref[...],
                        preferred_element_type=jnp.float32)
        out_ref[...] = jnp.maximum(h_out, 0.0).astype(out_ref.dtype)
        # TODO(synk): dropout(p=0.3) skipped -> eval-mode semantics (identity).


def gcn2_layer_fc_kernel(a_ref, h_ref, x0_ref, w_ref, wfc_ref, bfc_ref,
                         out_ref, acc_ref, *, alpha, tk, resident):
    """Second GCN2Conv layer with the final Linear fused into the epilogue."""
    k = pl.program_id(1)

    @pl.when(k == 0)
    def _():
        acc_ref[...] = jnp.zeros_like(acc_ref)

    acc_ref[...] += jnp.dot(a_ref[...], _h_tile(h_ref, k, tk, resident),
                            preferred_element_type=jnp.float32)

    @pl.when(k == pl.num_programs(1) - 1)
    def _():
        mixed = acc_ref[...] + alpha * x0_ref[...].astype(jnp.float32)
        h = jnp.maximum(
            jnp.dot(mixed.astype(jnp.bfloat16), w_ref[...],
                    preferred_element_type=jnp.float32), 0.0)
        out = jnp.dot(h.astype(jnp.bfloat16), wfc_ref[...],
                      preferred_element_type=jnp.float32) + bfc_ref[...]
        out_ref[...] = out.astype(out_ref.dtype)


# ------------------------------ pallas_call glue ------------------------------
def _round_up(x, m):
    return ((x + m - 1) // m) * m


def _select_tiling(n):
    """Pick (n_pad, tm, tk) with tm | tk | n_pad.  Big tiles amortize step overhead."""
    if n <= 1024:
        n_pad = _round_up(max(n, 128), 128)
        return n_pad, n_pad, n_pad           # single tile per axis
    tm, tk = 512, 2048                        # 2 MiB bf16 A tile per step
    n_pad = _round_up(n, tk)                  # n_pad/tm is a multiple of 4 -> megacore OK
    return n_pad, tm, tk


def _gcn2_conv(a, h, x0, w, *, alpha, tm, tk, wfc=None, bfc=None):
    """Tiled GCN2 layer.  If wfc/bfc given, fuses the final Linear (f32 output)."""
    n_pad = a.shape[0]
    f_pad = w.shape[0]
    grid = (n_pad // tm, n_pad // tk)

    # Keep h VMEM-resident (DMA'd once) unless it would blow the VMEM budget.
    h_resident = (2 * n_pad * f_pad * jnp.dtype(h.dtype).itemsize) <= _H_RESIDENT_BUDGET
    if h_resident:
        h_spec = pl.BlockSpec((n_pad, f_pad), lambda i, k: (0, 0))
    else:
        h_spec = pl.BlockSpec((tk, f_pad), lambda i, k: (k, 0))

    in_specs = [
        pl.BlockSpec((tm, tk), lambda i, k: (i, k)),          # A' tile (bf16)
        h_spec,                                               # h (bf16)
        pl.BlockSpec((tm, f_pad), lambda i, k: (i, 0)),       # x0 tile (bf16)
        pl.BlockSpec((f_pad, f_pad), lambda i, k: (0, 0)),    # W (bf16)
    ]
    flops = 2 * n_pad * n_pad * f_pad + 2 * n_pad * f_pad * f_pad

    if wfc is None:
        kernel = functools.partial(gcn2_layer_kernel, alpha=alpha, tk=tk,
                                   resident=h_resident)
        out_cols, out_dtype = f_pad, jnp.bfloat16
        args = (a, h, x0, w)
    else:
        out_pad = wfc.shape[1]
        in_specs += [
            pl.BlockSpec((f_pad, out_pad), lambda i, k: (0, 0)),  # W_fc (bf16)
            pl.BlockSpec((1, out_pad), lambda i, k: (0, 0)),      # b_fc (f32)
        ]
        kernel = functools.partial(gcn2_layer_fc_kernel, alpha=alpha, tk=tk,
                                   resident=h_resident)
        out_cols, out_dtype = out_pad, jnp.float32
        args = (a, h, x0, w, wfc, bfc)
        flops += 2 * n_pad * f_pad * out_pad

    bytes_accessed = (
        sum(int(v.size) * jnp.dtype(v.dtype).itemsize for v in args)
        + n_pad * out_cols * jnp.dtype(out_dtype).itemsize)

    return pl.pallas_call(
        kernel,
        out_shape=jax.ShapeDtypeStruct((n_pad, out_cols), out_dtype),
        grid_spec=pltpu.PrefetchScalarGridSpec(
            num_scalar_prefetch=0,
            grid=grid,
            in_specs=in_specs,
            out_specs=pl.BlockSpec((tm, out_cols), lambda i, k: (i, 0)),
            scratch_shapes=[pltpu.VMEM((tm, f_pad), jnp.float32)],
        ),
        compiler_params=pltpu.CompilerParams(
            dimension_semantics=("parallel", "arbitrary"),
            vmem_limit_bytes=_VMEM_LIMIT_BYTES),
        cost_estimate=pl.CostEstimate(flops=flops, transcendentals=0,
                                      bytes_accessed=bytes_accessed),
    )(*args)


def gcnii_forward(a_norm, x, w1, w2, w_fc_t, b_fc, *, alpha=0.5):
    """GCNII_Net forward: 2x GCN2Conv (beta=1.0) + Linear, on a dense A_hat."""
    n, f = x.shape
    out_feats = w_fc_t.shape[1]

    # ---- tiling / lane-dense padding (zero padding is exact: relu(0)=0) ----
    n_pad, tm, tk = _select_tiling(n)
    f_pad = _round_up(max(f, 128), 128)
    out_pad = _round_up(max(out_feats, 128), 128)

    # Fold (1-alpha) into A and cast to bf16 BEFORE padding (no n_pad^2 f32 temporary).
    a_scaled = ((1.0 - alpha) * a_norm).astype(jnp.bfloat16)
    a_p = jnp.zeros((n_pad, n_pad), jnp.bfloat16).at[:n, :n].set(a_scaled)
    # TODO(synk): on v7x, an fp8(e4m3) A_hat would halve the dominant HBM stream.

    x_p = jnp.zeros((n_pad, f_pad), jnp.bfloat16).at[:n, :f].set(
        x.astype(jnp.bfloat16))                           # bf16 MXU operand & residual
    w1_p = jnp.zeros((f_pad, f_pad), jnp.bfloat16).at[:f, :f].set(
        w1.astype(jnp.bfloat16))
    w2_p = jnp.zeros((f_pad, f_pad), jnp.bfloat16).at[:f, :f].set(
        w2.astype(jnp.bfloat16))
    wfc_p = jnp.zeros((f_pad, out_pad), jnp.bfloat16).at[:f, :out_feats].set(
        w_fc_t.astype(jnp.bfloat16))
    bfc_p = jnp.zeros((1, out_pad), jnp.float32).at[0, :out_feats].set(b_fc)

    h1 = _gcn2_conv(a_p, x_p, x_p, w1_p, alpha=alpha, tm=tm, tk=tk)
    out = _gcn2_conv(a_p, h1, x_p, w2_p, alpha=alpha, tm=tm, tk=tk,
                     wfc=wfc_p, bfc=bfc_p)
    return out[:n, :out_feats]
    # TODO(synk): for very large sparse graphs, replace the dense A_hat with a
    # scalar-prefetch CSR-block gather aggregation instead of a dense matmul.


# --------------------------- JAX glue (no hot path) --------------------------
def gcn_norm_dense(edge_index, edge_weight, num_nodes):
    """Dense D^{-1/2}(A+I)D^{-1/2}, matching PyG gcn_norm (source_to_target flow)."""
    row, col = edge_index[0], edge_index[1]
    loop = jnp.arange(num_nodes, dtype=row.dtype)
    row = jnp.concatenate([row, loop])
    col = jnp.concatenate([col, loop])
    ew = jnp.concatenate(
        [edge_weight, jnp.ones((num_nodes,), dtype=edge_weight.dtype)])
    deg = jnp.zeros((num_nodes,), dtype=ew.dtype).at[col].add(ew)
    dinv = jnp.where(deg > 0, 1.0 / jnp.sqrt(deg), 0.0)
    norm = dinv[row] * ew * dinv[col]
    # A[target, source] = norm  so that (A @ x)[i] = sum_{j->i} norm_ij * x[j]
    a = jnp.zeros((num_nodes, num_nodes), dtype=ew.dtype).at[col, row].add(norm)
    return a


def glorot(key, shape):
    fan_in, fan_out = shape[0], shape[1]
    limit = jnp.sqrt(6.0 / (fan_in + fan_out))
    return jax.random.uniform(key, shape, jnp.float32, -limit, limit)


if __name__ == "__main__":
    # Small deterministic problem: 16 nodes, in_feats=32, out_feats=8, 48 edges.
    N, IN_FEATS, OUT_FEATS, N_EDGES = 16, 32, 8, 48
    ALPHA = 0.5

    key = jax.random.PRNGKey(0)
    kx, ke_src, ke_dst, kw, k1, k2, kfc, kb = jax.random.split(key, 8)

    x = jax.random.normal(kx, (N, IN_FEATS), jnp.float32)
    src = jax.random.randint(ke_src, (N_EDGES,), 0, N, jnp.int32)
    # avoid self-loops in the random edge list (gcn_norm adds them itself)
    dst = (src + 1 + jax.random.randint(ke_dst, (N_EDGES,), 0, N - 1, jnp.int32)) % N
    edge_index = jnp.stack([src, dst], axis=0)               # [2, E]
    edge_weight = jax.random.uniform(kw, (N_EDGES,), jnp.float32, 0.5, 1.5)

    # Parameters (deterministic in-script init; shapes match the PyTorch module).
    w1 = glorot(k1, (IN_FEATS, IN_FEATS))                     # GCN2Conv[0].weight1
    w2 = glorot(k2, (IN_FEATS, IN_FEATS))                     # GCN2Conv[1].weight1
    w_fc = glorot(kfc, (OUT_FEATS, IN_FEATS))                 # nn.Linear weight [out, in]
    b_fc = jax.random.uniform(kb, (OUT_FEATS,), jnp.float32, -0.1, 0.1)

    a_norm = gcn_norm_dense(edge_index, edge_weight, N)       # [N, N]

    out = gcnii_forward(
        a_norm, x, w1, w2,
        w_fc.T,                       # pre-transpose so kernel does h @ [F, out]
        b_fc,
        alpha=ALPHA,
    )
    out = jax.block_until_ready(out)
    assert out.shape == (N, OUT_FEATS) and out.dtype == jnp.float32
    assert bool(jnp.all(jnp.isfinite(out)))
    print("KERNEL_OK")
</pallas_src>

<mosaic_0001>
module attributes {stable_mosaic.version = 11 : i64} {
  func.func @gcn2_layer_kernel(%arg0: i32, %arg1: i32, %arg2: memref<128x128xbf16, #tpu.memory_space<vmem>>, %arg3: memref<128x128xbf16, #tpu.memory_space<vmem>>, %arg4: memref<128x128xbf16, #tpu.memory_space<vmem>>, %arg5: memref<128x128xbf16, #tpu.memory_space<vmem>>, %arg6: memref<128x128xbf16, #tpu.memory_space<vmem>>, %arg7: memref<128x128xf32, #tpu.memory_space<vmem>>) attributes {dimension_semantics = [#tpu.dimension_semantics<parallel>, #tpu.dimension_semantics<arbitrary>], iteration_bounds = array<i64: 1, 1>, scalar_prefetch = 0 : i64, scratch_operands = 1 : i64, tpu.core_type = #tpu.core_type<tc>, window_params = [{transform_indices = @transform_0, window_bounds = array<i64: 128, 128>}, {pipeline_mode = #tpu.pipeline_mode<synchronous>, transform_indices = @transform_1, window_bounds = array<i64: 128, 128>}, {transform_indices = @transform_2, window_bounds = array<i64: 128, 128>}, {pipeline_mode = #tpu.pipeline_mode<synchronous>, transform_indices = @transform_3, window_bounds = array<i64: 128, 128>}, {transform_indices = @transform_4, window_bounds = array<i64: 128, 128>}]} {
    %c0_i32 = arith.constant 0 : i32
    %0 = arith.cmpi eq, %arg1, %c0_i32 : i32
    %1 = arith.extui %0 : i1 to i32
    %c0_i32_0 = arith.constant 0 : i32
    %2 = arith.cmpi ne, %1, %c0_i32_0 : i32
    scf.if %2 {
      %cst_9 = arith.constant 0.000000e+00 : f32
      %15 = vector.broadcast %cst_9 : f32 to vector<128x128xf32>
      %c0_10 = arith.constant 0 : index
      %c0_11 = arith.constant 0 : index
      %16 = vector.load %arg7[%c0_10, %c0_11] : memref<128x128xf32, #tpu.memory_space<vmem>>, vector<128x128xf32>
      tpu.vector_store %arg7[%c0_10, %c0_11], %15 {strides = array<i32>} : memref<128x128xf32, #tpu.memory_space<vmem>>, vector<128x128xf32>,
    } else {
    }
    %c0 = arith.constant 0 : index
    %c0_1 = arith.constant 0 : index
    %3 = vector.load %arg7[%c0, %c0_1] : memref<128x128xf32, #tpu.memory_space<vmem>>, vector<128x128xf32>
    %c0_2 = arith.constant 0 : index
    %c0_3 = arith.constant 0 : index
    %4 = vector.load %arg2[%c0_2, %c0_3] : memref<128x128xbf16, #tpu.memory_space<vmem>>, vector<128x128xbf16>
    %c128_i32 = arith.constant 128 : i32
    %5 = arith.muli %arg1, %c128_i32 : i32
    %6 = tpu.assume_multiple %5, 128 : i32
    %7 = arith.index_cast %6 : i32 to index
    %c0_4 = arith.constant 0 : index
    %8 = vector.load %arg3[%7, %c0_4] : memref<128x128xbf16, #tpu.memory_space<vmem>>, vector<128x128xbf16>
    %cst = arith.constant dense<0.000000e+00> : vector<128x128xf32>
    %9 = tpu.matmul %4, %8, %cst {dimension_numbers = #tpu.dot_dimension_numbers<[1], [0], [0], [1], [0, 0, 1, 1], [], []>} : vector<128x128xbf16>, vector<128x128xbf16>, vector<128x128xf32> -> vector<128x128xf32>
    %10 = arith.addf %3, %9 : vector<128x128xf32>
    %c0_5 = arith.constant 0 : index
    %c0_6 = arith.constant 0 : index
    %11 = vector.load %arg7[%c0_5, %c0_6] : memref<128x128xf32, #tpu.memory_space<vmem>>, vector<128x128xf32>
    tpu.vector_store %arg7[%c0_5, %c0_6], %10 {strides = array<i32>} : memref<128x128xf32, #tpu.memory_space<vmem>>, vector<128x128xf32>,
    %c0_i32_7 = arith.constant 0 : i32
    %12 = arith.cmpi eq, %arg1, %c0_i32_7 : i32
    %13 = arith.extui %12 : i1 to i32
    %c0_i32_8 = arith.constant 0 : i32
    %14 = arith.cmpi ne, %13, %c0_i32_8 : i32
    scf.if %14 {
      %c0_9 = arith.constant 0 : index
      %c0_10 = arith.constant 0 : index
      %15 = vector.load %arg7[%c0_9, %c0_10] : memref<128x128xf32, #tpu.memory_space<vmem>>, vector<128x128xf32>
      %c0_11 = arith.constant 0 : index
      %c0_12 = arith.constant 0 : index
      %16 = vector.load %arg4[%c0_11, %c0_12] : memref<128x128xbf16, #tpu.memory_space<vmem>>, vector<128x128xbf16>
      %17 = arith.extf %16 : vector<128x128xbf16> to vector<128x128xf32>
      %cst_13 = arith.constant 5.000000e-01 : f32
      %18 = vector.broadcast %cst_13 : f32 to vector<128x128xf32>
      %19 = arith.mulf %18, %17 : vector<128x128xf32>
      %20 = arith.addf %15, %19 : vector<128x128xf32>
      %21 = arith.truncf %20 : vector<128x128xf32> to vector<128x128xbf16>
      %c0_14 = arith.constant 0 : index
      %c0_15 = arith.constant 0 : index
      %22 = vector.load %arg5[%c0_14, %c0_15] : memref<128x128xbf16, #tpu.memory_space<vmem>>, vector<128x128xbf16>
      %cst_16 = arith.constant dense<0.000000e+00> : vector<128x128xf32>
      %23 = tpu.matmul %21, %22, %cst_16 {dimension_numbers = #tpu.dot_dimension_numbers<[1], [0], [0], [1], [0, 0, 1, 1], [], []>} : vector<128x128xbf16>, vector<128x128xbf16>, vector<128x128xf32> -> vector<128x128xf32>
      %cst_17 = arith.constant 0.000000e+00 : f32
      %24 = vector.broadcast %cst_17 : f32 to vector<128x128xf32>
      %25 = arith.maximumf %23, %24 : vector<128x128xf32>
      %26 = arith.truncf %25 : vector<128x128xf32> to vector<128x128xbf16>
      %c0_18 = arith.constant 0 : index
      %c0_19 = arith.constant 0 : index
      %27 = vector.load %arg6[%c0_18, %c0_19] : memref<128x128xbf16, #tpu.memory_space<vmem>>, vector<128x128xbf16>
      tpu.vector_store %arg6[%c0_18, %c0_19], %26 {strides = array<i32>} : memref<128x128xbf16, #tpu.memory_space<vmem>>, vector<128x128xbf16>,
    } else {
    }
    return
  }
  func.func @transform_0(%arg0: i32, %arg1: i32) -> (i32, i32) {
    %c0_i32 = arith.constant 0 : i32
    return %arg0, %arg1 : i32, i32
  }
  func.func @transform_1(%arg0: i32, %arg1: i32) -> (i32, i32) {
    %c0_i32 = arith.constant 0 : i32
    %c0_i32_0 = arith.constant 0 : i32
    %c0_i32_1 = arith.constant 0 : i32
    return %c0_i32, %c0_i32_0 : i32, i32
  }
  func.func @transform_2(%arg0: i32, %arg1: i32) -> (i32, i32) {
    %c0_i32 = arith.constant 0 : i32
    %c0_i32_0 = arith.constant 0 : i32
    return %arg0, %c0_i32 : i32, i32
  }
  func.func @transform_3(%arg0: i32, %arg1: i32) -> (i32, i32) {
    %c0_i32 = arith.constant 0 : i32
    %c0_i32_0 = arith.constant 0 : i32
    %c0_i32_1 = arith.constant 0 : i32
    return %c0_i32, %c0_i32_0 : i32, i32
  }
  func.func @transform_4(%arg0: i32, %arg1: i32) -> (i32, i32) {
    %c0_i32 = arith.constant 0 : i32
    %c0_i32_0 = arith.constant 0 : i32
    return %arg0, %c0_i32 : i32, i32
  }
}

</mosaic_0001>

<bundles_post_ra>
// kernel: tpu_custom_call.1
= control target key start
LH: loop header
LB: loop body
LE: loop exit
PB: predicated region body
PF: predicated region fallthrough
CT: control target
= control target key end

     0   :  { %9 = vsyncpa [#allocation4], 0  ;;  %s1180_s0 = inlined_call_operand.hbm [shape: bf16[128,128], index: 0, kind: input, shape index: {}]   ;;  %s1181_s1 = inlined_call_operand.hbm [shape: bf16[128,128], index: 1, kind: input, shape index: {}]   ;;  %s1182_s2 = inlined_call_operand.hbm [shape: bf16[128,128], index: 2, kind: input, shape index: {}]   ;;  %s1183_s3 = inlined_call_operand.hbm [shape: bf16[128,128], index: 3, kind: input, shape index: {}]   ;;  %s1184_s4 = inlined_call_operand.hbm [shape: bf16[128,128], index: 4, kind: output, shape index: {}]  }
   0x1   :  { %10 = vsyncpa [#allocation7], 0 }
   0x2   :  { %11 = vsyncpa [#allocation10], 0 }
   0x3   :  { %12 = vsyncpa [#allocation5], 0  ;;  %s1118_s15 = smov [#allocation6]   ;;  %s1119_s17 = smov [#allocation3]  }
   0x4   :  { %s30_s16 = sshll.u32 %s1118_s15, 4  ;;  %s18_s18 = sshll.u32 %s1119_s17, 4  ;;  %s31_s16 = int_to_ptr.vmem [resolvable:$true] %s30_s16  ;;  %s19_s18 = int_to_ptr.vmem [resolvable:$true] %s18_s18 }
   0x5   :  { %s1018_s19 = scalar_lea.vmem %s31_s16, 1024  ;;  %p1023_p1 = scmp.lt.s32.totalorder %s31_s16, %s31_s16 }
   0x6   :  { %p1019_p0 = scmp.ne.s32.totalorder %s31_s16, %s1018_s19  ;;  %p1024_p2 = scmp.lt.s32.totalorder %s1018_s19, %s1018_s19 }
   0x8   :  { %p1025_p3 = por %p1024_p2, %p1023_p1 }
   0xa   :  { %p1026_p4 = pnand %p1025_p3, %p1019_p0 }
   0xc   :  { %1029 = shalt.err (!%p1026_p4)
}
   0xd   :  { %s1120_s20 = smov 64   ;;  %s1121_s21 = smov 4  }
   0xe   :  { %36 = dma.hbm_to_vmem [thread:$0]  %s1181_s1, 1024, %s31_s16, [#allocation7], %s1120_s20, %s1120_s20, %s1121_s21  }
   0xf   :  { %s1038_s24 = scalar_lea.vmem %s19_s18, 1024  ;;  %p1043_p6 = scmp.lt.s32.totalorder %s19_s18, %s19_s18 }
  0x10   :  { %p1039_p5 = scmp.ne.s32.totalorder %s19_s18, %s1038_s24  ;;  %p1044_p7 = scmp.lt.s32.totalorder %s1038_s24, %s1038_s24 }
  0x12   :  { %p1045_p8 = por %p1044_p7, %p1043_p6 }
  0x14   :  { %p1046_p9 = pnand %p1045_p8, %p1039_p5 }
  0x16   :  { %1049 = shalt.err (!%p1046_p9)
}
  0x17   :  { %24 = dma.hbm_to_vmem [thread:$0]  %s1180_s0, 1024, %s19_s18, [#allocation4], %s1120_s20, %s1120_s20, %s1121_s21  }
  0x18   :  { %s1122_s27 = smov [#allocation8]   ;;  %s1123_s29 = smov [#allocation9]  }
  0x19   :  { %s42_s28 = sshll.u32 %s1122_s27, 4  ;;  %s54_s30 = sshll.u32 %s1123_s29, 4  ;;  %s43_s28 = int_to_ptr.vmem [resolvable:$true] %s42_s28  ;;  %s55_s30 = int_to_ptr.vmem [resolvable:$true] %s54_s30 }
  0x1a   :  { %s1058_s1 = scalar_lea.vmem %s43_s28, 1024  ;;  %p1063_p11 = scmp.lt.s32.totalorder %s43_s28, %s43_s28 }
  0x1b   :  { %p1059_p10 = scmp.ne.s32.totalorder %s43_s28, %s1058_s1  ;;  %p1064_p12 = scmp.lt.s32.totalorder %s1058_s1, %s1058_s1 }
  0x1d   :  { %p1065_p13 = por %p1064_p12, %p1063_p11 }
  0x1f   :  { %p1066_p0 = pnand %p1065_p13, %p1059_p10 }
  0x21   :  { %1069 = shalt.err (!%p1066_p0)
}
  0x22   :  { %48 = dma.hbm_to_vmem [thread:$0]  %s1182_s2, 1024, %s43_s28, [#allocation7], %s1120_s20, %s1120_s20, %s1121_s21  }
  0x23   :  { %s1078_s0 = scalar_lea.vmem %s55_s30, 1024  ;;  %p1083_p2 = scmp.lt.s32.totalorder %s55_s30, %s55_s30 }
  0x24   :  { %p1079_p1 = scmp.ne.s32.totalorder %s55_s30, %s1078_s0  ;;  %p1084_p3 = scmp.lt.s32.totalorder %s1078_s0, %s1078_s0 }
  0x26   :  { %p1085_p4 = por %p1084_p3, %p1083_p2 }
  0x28   :  { %p1086_p5 = pnand %p1085_p4, %p1079_p1 }
  0x2a   :  { %1089 = shalt.err (!%p1086_p5)
}
  0x2b   :  { %60 = dma.hbm_to_vmem [thread:$0]  %s1183_s3, 1024, %s55_s30, [#allocation10], %s1120_s20, %s1120_s20, %s1121_s21  }
  0x2c   :  { %1110 = dma.done.wait [#allocation4], 1024  }
  0x2d   :  { %1111 = vsyncadd [#allocation4], 4294966272 }
  0x2e   :  { %1112 = dma.done.wait [#allocation7], 2048  }
  0x2f   :  { %1113 = vsyncadd [#allocation7], 4294965248 }
  0x30   :  { %1114 = dma.done.wait [#allocation10], 1024  }
  0x31   :  { %1115 = vsyncadd [#allocation10], 4294966272  ;;  %v986_v0 = vld [vmem:[#allocation6 + $0x38] sm:$0xff]   ;;  %v987_v1 = vld [vmem:[#allocation6 + $0x30] sm:$0xff]   ;;  %s1124_s2 = smov [#allocation11]  }
  0x32   :  { %915 = vmatprep.subr.bf16.mxu0 %v986_v0  ;;  %v988_v2 = vld [vmem:[#allocation6 + $0x28] sm:$0xff]   ;;  %v989_v3 = vld [vmem:[#allocation6 + $0x20] sm:$0xff]   ;;  %v990_v5 = vld [vmem:[#allocation6 + $0x18] sm:$0xff]   ;;  %s725_s3 = sshll.u32 %s1124_s2, 4  ;;  %s726_s3 = int_to_ptr.vmem [resolvable:$true] %s725_s3 }
  0x33   :  { %916 = vmatpush3.bf16.msra.mxu0 %v986_v0  ;;  %v994_v4 = vld [vmem:[#allocation3] sm:$0xff]   ;;  %v991_v6 = vld [vmem:[#allocation6 + $0x10] sm:$0xff]   ;;  %v1002_v7 = vld [vmem:[#allocation9 + $0x38] sm:$0xff]   ;;  %s1090_s9 = scalar_lea.vmem %s726_s3, 1024  ;;  %p1095_p7 = scmp.lt.s32.totalorder %s726_s3, %s726_s3 }
  0x34   :  { %917 = vmatprep.subr.bf16.mxu0 %v987_v1  ;;  %931 = vmatprep.mubr.bf16.mxu0 %v994_v4  ;;  %v1003_v8 = vld [vmem:[#allocation9 + $0x30] sm:$0xff]   ;;  %v992_v9 = vld [vmem:[#allocation6 + $0x8] sm:$0xff]   ;;  %v993_v11 = vld [vmem:[#allocation6] sm:$0xff]   ;;  %p1091_p6 = scmp.ne.s32.totalorder %s726_s3, %s1090_s9  ;;  %p1096_p8 = scmp.lt.s32.totalorder %s1090_s9, %s1090_s9 }
  0x35   :  { %947 = vmatprep.subr.bf16.mxu1 %v1002_v7  ;;  %v1004_v10 = vld [vmem:[#allocation9 + $0x28] sm:$0xff]   ;;  %v1005_v12 = vld [vmem:[#allocation9 + $0x20] sm:$0xff]   ;;  %v1006_v13 = vld [vmem:[#allocation9 + $0x18] sm:$0xff]  }
  0x36   :  { %948 = vmatpush3.bf16.msra.mxu1 %v1002_v7  ;;  %v995_v14 = vld [vmem:[#allocation3 + $0x8] sm:$0xff]   ;;  %v996_v15 = vld [vmem:[#allocation3 + $0x10] sm:$0xff]   ;;  %v997_v16 = vld [vmem:[#allocation3 + $0x18] sm:$0xff]   ;;  %p1097_p9 = por %p1096_p8, %p1095_p7 }
  0x37   :  { %918 = vmatpush3.bf16.msra.mxu0 %v987_v1  ;;  %949 = vmatprep.subr.bf16.mxu1 %v1003_v8  ;;  %v998_v17 = vld [vmem:[#allocation3 + $0x20] sm:$0xff]   ;;  %v999_v18 = vld [vmem:[#allocation3 + $0x28] sm:$0xff]   ;;  %v1000_v19 = vld [vmem:[#allocation3 + $0x30] sm:$0xff]  }
  0x38   :  { %919 = vmatprep.subr.bf16.mxu0 %v988_v2  ;;  %v1001_v20 = vld [vmem:[#allocation3 + $0x38] sm:$0xff]   ;;  %v1007_v21 = vld [vmem:[#allocation9 + $0x10] sm:$0xff]   ;;  %v1008_v22 = vld [vmem:[#allocation9 + $0x8] sm:$0xff]   ;;  %p1098_p10 = pnand %p1097_p9, %p1091_p6 }
  0x39   :  { %v1009_v23 = vld [vmem:[#allocation9] sm:$0xff]   ;;  %v869_v25 = vld [vmem:[#allocation8 + $0x8] sm:$0xff]   ;;  %v870_v37 = vld [vmem:[#allocation8 + $0x10] sm:$0xff]  }
  0x3a   :  { %950 = vmatpush3.bf16.msra.mxu1 %v1003_v8  ;;  %v798_v24 = vld [vmem:[#allocation8] sm:$0xff]   ;;  %v804_v26 = vunpack.c.h.bf16 %v869_v25  ;;  %v803_v30 = vunpack.c.l.bf16 %v869_v25  ;;  %v871_v38 = vld [vmem:[#allocation8 + $0x18] sm:$0xff]   ;;  %v807_v44 = vunpack.c.l.bf16 %v870_v37  ;;  %v808_v45 = vunpack.c.h.bf16 %v870_v37  ;;  %v873_v58 = vld [vmem:[#allocation8 + $0x28] sm:$0xff]  }
  0x3b   :  { %920 = vmatpush3.bf16.msra.mxu0 %v988_v2  ;;  %951 = vmatprep.subr.bf16.mxu1 %v1004_v10  ;;  %v799_v27 = vunpack.c.l.bf16 %v798_v24  ;;  %v800_v28 = vunpack.c.h.bf16 %v798_v24  ;;  %v812_v41 = vunpack.c.h.bf16 %v871_v38  ;;  %v811_v48 = vunpack.c.l.bf16 %v871_v38  ;;  %v872_v57 = vld [vmem:[#allocation8 + $0x20] sm:$0xff]  }
  0x3c   :  { %921 = vmatprep.subr.bf16.mxu0 %v989_v3  ;;  %v426_v32 = vmul.f32 0.5, %v804_v26  ;;  %v425_v35 = vmul.f32 0.5, %v803_v30  ;;  %v427_v53 = vmul.f32 0.5, %v807_v44  ;;  %v428_v54 = vmul.f32 0.5, %v808_v45 }
  0x3d   :  { %v423_v33 = vmul.f32 0.5, %v799_v27  ;;  %v424_v34 = vmul.f32 0.5, %v800_v28  ;;  %v430_v52 = vmul.f32 0.5, %v812_v41  ;;  %v429_v55 = vmul.f32 0.5, %v811_v48 }
  0x3e   :  { %952 = vmatpush3.bf16.msra.mxu1 %v1004_v10  ;;  %v820_v61 = vunpack.c.h.bf16 %v873_v58  ;;  %v815_v0 = vunpack.c.l.bf16 %v872_v57  ;;  %v816_v1 = vunpack.c.h.bf16 %v872_v57  ;;  %v819_v4 = vunpack.c.l.bf16 %v873_v58 }
  0x3f   :  { %922 = vmatpush3.bf16.msra.mxu0 %v989_v3  ;;  %953 = vmatprep.subr.bf16.mxu1 %v1005_v12 }
  0x40   :  { %923 = vmatprep.subr.bf16.mxu0 %v990_v5  ;;  %v434_v8 = vmul.f32 0.5, %v820_v61  ;;  %v432_v10 = vmul.f32 0.5, %v816_v1 }
  0x42   :  { %954 = vmatpush3.bf16.msra.mxu1 %v1005_v12 }
  0x43   :  { %924 = vmatpush3.bf16.msra.mxu0 %v990_v5  ;;  %955 = vmatprep.subr.bf16.mxu1 %v1006_v13 }
  0x44   :  { %925 = vmatprep.subr.bf16.mxu0 %v991_v6 }
  0x46   :  { %956 = vmatpush3.bf16.msra.mxu1 %v1006_v13  ;;  %v874_v13 = vld [vmem:[#allocation8 + $0x30] sm:$0xff]  }
  0x47   :  { %926 = vmatpush3.bf16.msra.mxu0 %v991_v6  ;;  %957 = vmatprep.subr.bf16.mxu1 %v1007_v21 }
  0x48   :  { %927 = vmatprep.subr.bf16.mxu0 %v992_v9 }
  0x4a   :  { %958 = vmatpush3.bf16.msra.mxu1 %v1007_v21  ;;  %v824_v21 = vunpack.c.h.bf16 %v874_v13 }
  0x4b   :  { %928 = vmatpush3.bf16.msra.mxu0 %v992_v9  ;;  %959 = vmatprep.subr.bf16.mxu1 %v1008_v22  ;;  %v431_v9 = vmul.f32 0.5, %v815_v0 }
  0x4c   :  { %929 = vmatprep.subr.bf16.mxu0 %v993_v11  ;;  %v436_v30 = vmul.f32 0.5, %v824_v21 }
  0x4e   :  { %960 = vmatpush3.bf16.msra.mxu1 %v1008_v22 }
  0x4f   :  { %930 = vmatpush3.bf16.msra.mxu0 %v993_v11  ;;  %961 = vmatprep.subr.bf16.mxu1 %v1009_v23  ;;  %v433_v11 = vmul.f32 0.5, %v819_v4 }
  0x52   :  { %932 = vmatmul.mubr.bf16.vlgmr.msra.gmra.mxu0 %v995_v14  ;;  %962 = vmatpush3.bf16.msra.mxu1 %v1009_v23  ;;  %v875_v14 = vld [vmem:[#allocation8 + $0x38] sm:$0xff]  }
  0x53   :  { %935 = vmatprep.mubr.bf16.mxu0 %v996_v15  ;;  %v827_v24 = vunpack.c.l.bf16 %v875_v14 }
  0x5a   :  { %936 = vmatmul.mubr.bf16.gmra.mxu0 %v997_v16 }
  0x5b   :  { %939 = vmatprep.mubr.bf16.mxu0 %v998_v17  ;;  %v828_v17 = vunpack.c.h.bf16 %v875_v14 }
  0x5d   :  { %v438_v28 = vmul.f32 0.5, %v828_v17 }
  0x62   :  { %940 = vmatmul.mubr.bf16.gmra.mxu0 %v999_v18 }
  0x63   :  { %943 = vmatprep.mubr.bf16.mxu0 %v1000_v19 }
  0x6a   :  { %944 = vmatmul.mubr.bf16.gmra.mxu0 %v1001_v20  ;;  %v823_v20 = vunpack.c.l.bf16 %v874_v13 }
 0x112   :  { %v933_v29 = vpop.f32.mrf.mxu0 }
 0x113   :  { %v441_v46 = vadd.f32 %v933_v29, %v425_v35  ;;  %v435_v29 = vmul.f32 0.5, %v823_v20 }
 0x114   :  { %v277_v31 = vpop.f32.mrf.mxu0 }
 0x115   :  { %v439_v42 = vadd.f32 %v423_v33, %v277_v31  ;;  %v437_v31 = vmul.f32 0.5, %v827_v24 }
 0x116   :  { %v934_v36 = vpop.f32.mrf.mxu0 }
 0x117   :  { %v442_v39 = vadd.f32 %v934_v36, %v426_v32 }
 0x118   :  { %v280_v40 = vpop.f32.mrf.mxu0 }
 0x119   :  { %v440_v43 = vadd.f32 %v424_v34, %v280_v40  ;;  %v456_v50 = vpack.c.bf16 %v442_v39, %v441_v46 }
 0x11a   :  { %v937_v47 = vpop.f32.mrf.mxu0 }
 0x11b   :  { %v455_v49 = vpack.c.bf16 %v440_v43, %v439_v42  ;;  %v445_v2 = vadd.f32 %v937_v47, %v429_v55 }
 0x11c   :  { %v293_v51 = vpop.f32.mrf.mxu0 }
 0x11d   :  { %963 = vmatprep.mubr.bf16.mxu1 %v455_v49  ;;  %v443_v62 = vadd.f32 %v427_v53, %v293_v51 }
 0x11e   :  { %v938_v56 = vpop.f32.mrf.mxu0  ;;  %964 = vmatmul.mubr.bf16.vlgmr.msra.gmra.mxu1 %v456_v50 }
 0x11f   :  { %v446_v59 = vadd.f32 %v938_v56, %v430_v52 }
 0x120   :  { %v296_v60 = vpop.f32.mrf.mxu0 }
 0x121   :  { %v444_v63 = vadd.f32 %v428_v54, %v296_v60  ;;  %v458_v6 = vpack.c.bf16 %v446_v59, %v445_v2 }
 0x122   :  { %v941_v3 = vpop.f32.mrf.mxu0 }
 0x123   :  { %v457_v5 = vpack.c.bf16 %v444_v63, %v443_v62  ;;  %v449_v22 = vadd.f32 %v941_v3, %v433_v11 }
 0x124   :  { %v309_v7 = vpop.f32.mrf.mxu0 }
 0x125   :  { %967 = vmatprep.mubr.bf16.mxu1 %v457_v5  ;;  %v447_v18 = vadd.f32 %v431_v9, %v309_v7 }
 0x126   :  { %v942_v12 = vpop.f32.mrf.mxu0  ;;  %968 = vmatmul.mubr.bf16.gmra.mxu1 %v458_v6 }
 0x127   :  { %v450_v15 = vadd.f32 %v942_v12, %v434_v8 }
 0x128   :  { %v312_v16 = vpop.f32.mrf.mxu0 }
 0x129   :  { %v448_v19 = vadd.f32 %v432_v10, %v312_v16  ;;  %v460_v26 = vpack.c.bf16 %v450_v15, %v449_v22 }
 0x12a   :  { %v945_v23 = vpop.f32.mrf.mxu0 }
 0x12b   :  { %v459_v25 = vpack.c.bf16 %v448_v19, %v447_v18  ;;  %v453_v37 = vadd.f32 %v945_v23, %v437_v31 }
 0x12c   :  { %v325_v27 = vpop.f32.mrf.mxu0 }
 0x12d   :  { %971 = vmatprep.mubr.bf16.mxu1 %v459_v25  ;;  %v451_v35 = vadd.f32 %v435_v29, %v325_v27 }
 0x12e   :  { %v946_v32 = vpop.f32.mrf.mxu0  ;;  %972 = vmatmul.mubr.bf16.gmra.mxu1 %v460_v26 }
 0x12f   :  { %v454_v33 = vadd.f32 %v946_v32, %v438_v28 }
 0x130   :  { %v328_v34 = vpop.f32.mrf.mxu0 }
 0x131   :  { %v452_v36 = vadd.f32 %v436_v30, %v328_v34  ;;  %v462_v39 = vpack.c.bf16 %v454_v33, %v453_v37 }
 0x133   :  { %v461_v38 = vpack.c.bf16 %v452_v36, %v451_v35 }
 0x135   :  { %975 = vmatprep.mubr.bf16.mxu1 %v461_v38 }
 0x136   :  { %976 = vmatmul.mubr.bf16.gmra.mxu1 %v462_v39 }
 0x1de   :  { %v965_v40 = vpop.f32.mrf.mxu1 }
 0x1df   :  { %v626_v43 = vmax.f32 %v965_v40, 0.0 }
 0x1e0   :  { %v561_v41 = vpop.f32.mrf.mxu1 }
 0x1e1   :  { %v624_v46 = vmax.f32 %v561_v41, 0.0 }
 0x1e2   :  { %v966_v42 = vpop.f32.mrf.mxu1 }
 0x1e3   :  { %v627_v44 = vmax.f32 %v966_v42, 0.0 }
 0x1e4   :  { %v564_v45 = vpop.f32.mrf.mxu1 }
 0x1e5   :  { %v837_v47 = vpack.c.bf16 %v627_v44, %v626_v43  ;;  %v625_v48 = vmax.f32 %v564_v45, 0.0 }
 0x1e6   :  { %v969_v49 = vpop.f32.mrf.mxu1 }
 0x1e7   :  { %876 = vst [vmem:[#allocation11 + $0x8] sm:$0xff] %v837_v47   ;;  %v832_v50 = vpack.c.bf16 %v625_v48, %v624_v46  ;;  %v630_v53 = vmax.f32 %v969_v49, 0.0 }
 0x1e8   :  { %v577_v51 = vpop.f32.mrf.mxu1 }
 0x1e9   :  { %833 = vst [vmem:[#allocation11] sm:$0xff] %v832_v50   ;;  %v628_v56 = vmax.f32 %v577_v51, 0.0 }
 0x1ea   :  { %v970_v52 = vpop.f32.mrf.mxu1 }
 0x1eb   :  { %v631_v54 = vmax.f32 %v970_v52, 0.0 }
 0x1ec   :  { %v580_v55 = vpop.f32.mrf.mxu1 }
 0x1ed   :  { %v847_v57 = vpack.c.bf16 %v631_v54, %v630_v53  ;;  %v629_v58 = vmax.f32 %v580_v55, 0.0 }
 0x1ee   :  { %v973_v59 = vpop.f32.mrf.mxu1 }
 0x1ef   :  { %878 = vst [vmem:[#allocation11 + $0x18] sm:$0xff] %v847_v57   ;;  %v842_v60 = vpack.c.bf16 %v629_v58, %v628_v56  ;;  %v634_v63 = vmax.f32 %v973_v59, 0.0 }
 0x1f0   :  { %v593_v61 = vpop.f32.mrf.mxu1 }
 0x1f1   :  { %877 = vst [vmem:[#allocation11 + $0x10] sm:$0xff] %v842_v60   ;;  %v632_v2 = vmax.f32 %v593_v61, 0.0 }
 0x1f2   :  { %v974_v62 = vpop.f32.mrf.mxu1 }
 0x1f3   :  { %v635_v0 = vmax.f32 %v974_v62, 0.0 }
 0x1f4   :  { %v596_v1 = vpop.f32.mrf.mxu1 }
 0x1f5   :  { %v857_v3 = vpack.c.bf16 %v635_v0, %v634_v63  ;;  %v633_v4 = vmax.f32 %v596_v1, 0.0 }
 0x1f6   :  { %v977_v5 = vpop.f32.mrf.mxu1 }
 0x1f7   :  { %880 = vst [vmem:[#allocation11 + $0x28] sm:$0xff] %v857_v3   ;;  %v852_v6 = vpack.c.bf16 %v633_v4, %v632_v2  ;;  %v638_v9 = vmax.f32 %v977_v5, 0.0 }
 0x1f8   :  { %v609_v7 = vpop.f32.mrf.mxu1 }
 0x1f9   :  { %879 = vst [vmem:[#allocation11 + $0x20] sm:$0xff] %v852_v6   ;;  %v636_v12 = vmax.f32 %v609_v7, 0.0 }
 0x1fa   :  { %v978_v8 = vpop.f32.mrf.mxu1 }
 0x1fb   :  { %v639_v10 = vmax.f32 %v978_v8, 0.0 }
 0x1fc   :  { %v612_v11 = vpop.f32.mrf.mxu1 }
 0x1fd   :  { %v867_v13 = vpack.c.bf16 %v639_v10, %v638_v9  ;;  %v637_v14 = vmax.f32 %v612_v11, 0.0 }
 0x1ff   :  { %882 = vst [vmem:[#allocation11 + $0x38] sm:$0xff] %v867_v13   ;;  %v862_v15 = vpack.c.bf16 %v637_v14, %v636_v12 }
 0x201   :  { %881 = vst [vmem:[#allocation11 + $0x30] sm:$0xff] %v862_v15  }
 0x202   :  { %1101 = shalt.err (!%p1098_p10)
}
 0x203   :  { %731 = dma.vmem_to_hbm [thread:$0]  %s726_s3, 1024, %s1184_s4, [#allocation5], %s1120_s20, %s1120_s20, %s1121_s21  }
 0x204   :  { %1116 = dma.done.wait [#allocation5], 1024  }
 0x205   :  { %1117 = vsyncadd [#allocation5], 4294966272 }
 0x206   :  { %735 = vsyncpa [#allocation4], 1 }
 0x207   :  { %736 = vsyncpa [#allocation7], 1 }
 0x208   :  { %737 = vsyncpa [#allocation10], 1 }
 0x209   :  { %738 = vsyncpa [#allocation5], 1 }

</bundles_post_ra>
